<compile_context>
chip_gen: v7x
topology: tpu7x:2x2x1
jax: 0.10.0
libtpu: 0.0.40
codegen_flags: <defaults>
</compile_context>

<pallas_src>
import functools

import jax
import jax.numpy as jnp
from jax.experimental import pallas as pl
from jax.experimental.pallas import tpu as pltpu


def _dma_identity_kernel(x_ref, o_ref, sem, *, n_chunks, chunk_rows):
    """Copy x_ref (HBM) -> o_ref (HBM) with n_chunks overlapping DMAs."""
    copies = []
    for i in range(n_chunks):  # static Python loop: n_chunks is trace-time const
        lo = i * chunk_rows
        copies.append(
            pltpu.make_async_copy(
                x_ref.at[pl.ds(lo, chunk_rows), :],
                o_ref.at[pl.ds(lo, chunk_rows), :],
                sem.at[i],
            )
        )
    for cp in copies:
        cp.start()
    for cp in copies:
        cp.wait()


def _factor_rows_cols(total: int):
    """Pick a (rows, cols) factorization purely so we have a leading dim to
    chunk on; DMA bandwidth does not depend on the trailing width."""
    cols = total
    for c in (16384, 8192, 4096, 2048, 1024, 512, 256, 128):
        if total % c == 0:
            cols = c
            break
    return total // cols, cols


def base_model_forward(x: jax.Array) -> jax.Array:
    """Pallas implementation of BaseModel.forward semantics (identity copy).

    Accepts any shape (e.g. NCHW); returns an array of identical shape, dtype
    and values, with the copy performed as a direct HBM->HBM DMA inside a
    Pallas TPU kernel.
    """
    # Degenerate shapes: 0-d scalars and zero-size arrays pass straight through.
    if x.ndim == 0 or x.size == 0:
        return x

    orig_shape = x.shape
    total = x.size
    itemsize = jnp.dtype(x.dtype).itemsize

    rows, cols = _factor_rows_cols(total)

    # Up to 4 chunked DMAs for engine-level overlap (review suggestion).
    n_chunks = 1
    for c in (4, 2):
        if rows % c == 0:
            n_chunks = c
            break
    chunk_rows = rows // n_chunks

    x2d = x.reshape(rows, cols)

    kernel = functools.partial(
        _dma_identity_kernel, n_chunks=n_chunks, chunk_rows=chunk_rows
    )

    out2d = pl.pallas_call(
        kernel,
        out_shape=jax.ShapeDtypeStruct((rows, cols), x2d.dtype),
        in_specs=[pl.BlockSpec(memory_space=pl.ANY)],   # raw HBM ref, no auto-DMA
        out_specs=pl.BlockSpec(memory_space=pl.ANY),    # raw HBM ref, we DMA into it
        scratch_shapes=[pltpu.SemaphoreType.DMA((n_chunks,))],
        cost_estimate=pl.CostEstimate(
            flops=0,
            transcendentals=0,
            bytes_accessed=2 * total * itemsize,
        ),
        compiler_params=pltpu.CompilerParams(has_side_effects=True),
    )(x2d)

    return out2d.reshape(orig_shape)


if __name__ == "__main__":
    key = jax.random.PRNGKey(0)
    # Small NCHW input consistent with a conv-style model: batch=2, channels=4,
    # spatial=16x16.
    x = jax.random.normal(key, (2, 4, 16, 16), dtype=jnp.float32)

    y = base_model_forward(x)
    jax.block_until_ready(y)

    assert y.shape == x.shape and y.dtype == x.dtype
    assert bool(jnp.all(y == x))
    print("KERNEL_OK")
</pallas_src>

<mosaic_0001>
module attributes {stable_mosaic.version = 11 : i64} {
  func.func @_dma_identity_kernel(%arg0: memref<1x2048xf32, #tpu.memory_space<any>>, %arg1: memref<1x2048xf32, #tpu.memory_space<any>>, %arg2: memref<1x!tpu.dma_semaphore, #tpu.memory_space<semaphore_mem>>) attributes {dimension_semantics = [], scalar_prefetch = 0 : i64, scratch_operands = 1 : i64, tpu.core_type = #tpu.core_type<tc>} {
    %c0_i32 = arith.constant 0 : i32
    %c0_i32_0 = arith.constant 0 : i32
    %c0_i32_1 = arith.constant 0 : i32
    %0 = tpu.memref_slice %arg0[%c0_i32_0, %c0_i32_1] : memref<1x2048xf32, #tpu.memory_space<any>> -> memref<1x2048xf32, #tpu.memory_space<any>>
    %c0_i32_2 = arith.constant 0 : i32
    %c0_i32_3 = arith.constant 0 : i32
    %1 = tpu.memref_slice %arg1[%c0_i32_2, %c0_i32_3] : memref<1x2048xf32, #tpu.memory_space<any>> -> memref<1x2048xf32, #tpu.memory_space<any>>
    %2 = tpu.memref_slice %arg2[%c0_i32] : memref<1x!tpu.dma_semaphore, #tpu.memory_space<semaphore_mem>> -> memref<1x!tpu.dma_semaphore, #tpu.memory_space<semaphore_mem>>
    %3 = tpu.memref_squeeze %2 : memref<1x!tpu.dma_semaphore, #tpu.memory_space<semaphore_mem>> -> memref<!tpu.dma_semaphore, #tpu.memory_space<semaphore_mem>>
    tpu.enqueue_dma source(%0 : memref<1x2048xf32, #tpu.memory_space<any>>) target(%1 : memref<1x2048xf32, #tpu.memory_space<any>>) target_semaphore(%3 : memref<!tpu.dma_semaphore, #tpu.memory_space<semaphore_mem>>)
    %c0_i32_4 = arith.constant 0 : i32
    %c0_i32_5 = arith.constant 0 : i32
    %c0_i32_6 = arith.constant 0 : i32
    %4 = tpu.memref_slice %arg0[%c0_i32_5, %c0_i32_6] : memref<1x2048xf32, #tpu.memory_space<any>> -> memref<1x2048xf32, #tpu.memory_space<any>>
    %c0_i32_7 = arith.constant 0 : i32
    %c0_i32_8 = arith.constant 0 : i32
    %5 = tpu.memref_slice %arg1[%c0_i32_7, %c0_i32_8] : memref<1x2048xf32, #tpu.memory_space<any>> -> memref<1x2048xf32, #tpu.memory_space<any>>
    %6 = tpu.memref_slice %arg2[%c0_i32_4] : memref<1x!tpu.dma_semaphore, #tpu.memory_space<semaphore_mem>> -> memref<1x!tpu.dma_semaphore, #tpu.memory_space<semaphore_mem>>
    %7 = tpu.memref_squeeze %6 : memref<1x!tpu.dma_semaphore, #tpu.memory_space<semaphore_mem>> -> memref<!tpu.dma_semaphore, #tpu.memory_space<semaphore_mem>>
    tpu.wait_dma2 semaphore(%7 : memref<!tpu.dma_semaphore, #tpu.memory_space<semaphore_mem>>) src(%4 : memref<1x2048xf32, #tpu.memory_space<any>>) dst(%5 : memref<1x2048xf32, #tpu.memory_space<any>>)
    return
  }
}

</mosaic_0001>

<bundles_post_ra>
// kernel: tpu_custom_call.1
= control target key start
LH: loop header
LB: loop body
LE: loop exit
PB: predicated region body
PF: predicated region fallthrough
CT: control target
= control target key end

     0   :  { %s34_s6 = smov [#allocation2]   ;;  %s35_s7 = smov [#allocation3]   ;;  %s53_s0 = inlined_call_operand.hbm [shape: f32[1,2048], index: 0, kind: input, shape index: {}]   ;;  %s54_s1 = inlined_call_operand.hbm [shape: f32[1,2048], index: 1, kind: output, shape index: {}]  }
   0x1   :  { %s36_s8 = smov 0  }
   0x2   :  { %18 = dma.general %s53_s0, 256, %s54_s1, %s34_s6, %s35_s7, [#allocation4], %s36_s8, 0  }
   0x3   :  { %32 = dma.done.wait [#allocation2], 256 }
   0x4   :  { %33 = vsyncadd [#allocation2], 4294967040 }
   0x5   :  { %22 = vsyncmov [#allocation2] }
   0x8   :  { %s23_s13 = vpop.sfrf %22 }
   0x9   :  { %p28_p0 = scmp.ne.s32.totalorder %s23_s13, 0 }
   0xb   :  { %27 = shalt.err (%p28_p0)  }

</bundles_post_ra>
